<compile_context>
chip_gen: v7x
topology: tpu7x:2x2x1
jax: 0.10.0
libtpu: 0.0.40
codegen_flags: <defaults>
</compile_context>

<pallas_src>
import jax
import jax.numpy as jnp
from jax.experimental import pallas as pl
from jax.experimental.pallas import tpu as pltpu


def _round_up(n, m):
    return (n + m - 1) // m * m


def simplenet1d_kernel(x_ref, w1_ref, b1_ref, w2_ref, b2_ref, w3_ref, b3_ref,
                       sigma_ref, o_ref):
    # x tile is already bf16 (cast/pad done in the wrapper); weights are bf16,
    # biases f32. All matmuls accumulate in f32 on the MXU.
    x = x_ref[...]

    # fc1 + ReLU
    h = jnp.dot(x, w1_ref[...], preferred_element_type=jnp.float32) + b1_ref[...]
    h = jnp.maximum(h, 0.0)

    # fc2 + ReLU
    h = jnp.dot(h.astype(jnp.bfloat16), w2_ref[...],
                preferred_element_type=jnp.float32) + b2_ref[...]
    h = jnp.maximum(h, 0.0)

    # fc3
    out = jnp.dot(h.astype(jnp.bfloat16), w3_ref[...],
                  preferred_element_type=jnp.float32) + b3_ref[...]

    # divide by per-sample sigma: approx reciprocal runs on the EUP (free slot here)
    out = out * pl.reciprocal(sigma_ref[...], approx=True)

    o_ref[...] = out.astype(o_ref.dtype)


def simplenet1d_forward(x, y, params, sigmas, *, tm_max=512):
    """x: (B, data_dim) f32, y: (B,) int32 indices into sigmas."""
    w1, b1, w2, b2, w3, b3 = params
    B, D = x.shape
    H = w1.shape[1]

    LANE = 128
    DP = _round_up(D, LANE)          # lane-dense feature dims
    HP = _round_up(H, LANE)
    TM = min(tm_max, _round_up(B, 8))  # batch tile (rows of f32)
    BP = _round_up(B, TM)

    def pad2(a, rows, cols, dtype):
        buf = jnp.zeros((rows, cols), dtype)
        return buf.at[:a.shape[0], :a.shape[1]].set(a.astype(dtype))

    # zero-padded, bf16 weights / activations; f32 biases
    xp = pad2(x, BP, DP, jnp.bfloat16)
    w1p = pad2(w1, DP, HP, jnp.bfloat16)
    w2p = pad2(w2, HP, HP, jnp.bfloat16)
    w3p = pad2(w3, HP, DP, jnp.bfloat16)
    b1p = pad2(b1, 1, HP, jnp.float32)
    b2p = pad2(b2, 1, HP, jnp.float32)
    b3p = pad2(b3, 1, DP, jnp.float32)

    # glue: per-sample sigma gather; pad rows get 1.0 so the in-kernel reciprocal is benign
    used = sigmas[y].astype(jnp.float32).reshape(B, 1)
    sig = jnp.ones((BP, 1), jnp.float32).at[:B, :].set(used)

    grid = (BP // TM,)
    out = pl.pallas_call(
        simplenet1d_kernel,
        out_shape=jax.ShapeDtypeStruct((BP, DP), jnp.float32),
        grid_spec=pltpu.PrefetchScalarGridSpec(
            num_scalar_prefetch=0,
            grid=grid,
            in_specs=[
                pl.BlockSpec((TM, DP), lambda i: (i, 0)),   # x: streams per batch tile
                pl.BlockSpec((DP, HP), lambda i: (0, 0)),   # w1: VMEM-resident
                pl.BlockSpec((1, HP), lambda i: (0, 0)),    # b1
                pl.BlockSpec((HP, HP), lambda i: (0, 0)),   # w2
                pl.BlockSpec((1, HP), lambda i: (0, 0)),    # b2
                pl.BlockSpec((HP, DP), lambda i: (0, 0)),   # w3
                pl.BlockSpec((1, DP), lambda i: (0, 0)),    # b3
                pl.BlockSpec((TM, 1), lambda i: (i, 0)),    # per-sample sigma
            ],
            out_specs=pl.BlockSpec((TM, DP), lambda i: (i, 0)),
        ),
        compiler_params=pltpu.CompilerParams(
            dimension_semantics=("parallel",)),
    )(xp, w1p, b1p, w2p, b2p, w3p, b3p, sig)

    return out[:B, :D]


def init_params(key, data_dim, hidden_dim):
    """Deterministic Linear-style init; W stored transposed to (in, out)."""
    ks = jax.random.split(key, 6)

    def linear(kw, kb, fan_in, fan_out):
        bound = 1.0 / jnp.sqrt(fan_in)
        w = jax.random.uniform(kw, (fan_in, fan_out), jnp.float32, -bound, bound)
        b = jax.random.uniform(kb, (1, fan_out), jnp.float32, -bound, bound)
        return w, b

    w1, b1 = linear(ks[0], ks[1], data_dim, hidden_dim)
    w2, b2 = linear(ks[2], ks[3], hidden_dim, hidden_dim)
    w3, b3 = linear(ks[4], ks[5], hidden_dim, data_dim)
    return (w1, b1, w2, b2, w3, b3)


def reference_forward(x, y, params, sigmas):
    """Same math, same bf16-input / f32-accumulate precision as the kernel."""
    w1, b1, w2, b2, w3, b3 = params
    bf = jnp.bfloat16
    h = jnp.dot(x.astype(bf), w1.astype(bf), preferred_element_type=jnp.float32) + b1
    h = jnp.maximum(h, 0.0)
    h = jnp.dot(h.astype(bf), w2.astype(bf), preferred_element_type=jnp.float32) + b2
    h = jnp.maximum(h, 0.0)
    out = jnp.dot(h.astype(bf), w3.astype(bf), preferred_element_type=jnp.float32) + b3
    used = sigmas[y].reshape(x.shape[0], 1)
    return out / used


if __name__ == "__main__":
    key = jax.random.PRNGKey(0)
    k_x, k_y, k_p = jax.random.split(key, 3)

    batch, data_dim, hidden_dim, num_sigmas = 8, 16, 32, 10

    x = jax.random.normal(k_x, (batch, data_dim), jnp.float32)
    y = jax.random.randint(k_y, (batch,), 0, num_sigmas, jnp.int32)
    sigmas = jnp.exp(jnp.linspace(jnp.log(1.0), jnp.log(0.01), num_sigmas)).astype(jnp.float32)

    params = init_params(k_p, data_dim, hidden_dim)

    out = simplenet1d_forward(x, y, params, sigmas)
    jax.block_until_ready(out)

    ref = reference_forward(x, y, params, sigmas)
    assert out.shape == (batch, data_dim)
    assert jnp.allclose(out, ref, atol=1e-3, rtol=5e-3), (
        float(jnp.max(jnp.abs(out - ref))))

    print("KERNEL_OK")
</pallas_src>

<mosaic_0001>
module attributes {stable_mosaic.version = 11 : i64} {
  func.func @simplenet1d_kernel(%arg0: i32, %arg1: memref<8x128xbf16, #tpu.memory_space<vmem>>, %arg2: memref<128x128xbf16, #tpu.memory_space<vmem>>, %arg3: memref<1x128xf32, #tpu.memory_space<vmem>>, %arg4: memref<128x128xbf16, #tpu.memory_space<vmem>>, %arg5: memref<1x128xf32, #tpu.memory_space<vmem>>, %arg6: memref<128x128xbf16, #tpu.memory_space<vmem>>, %arg7: memref<1x128xf32, #tpu.memory_space<vmem>>, %arg8: memref<8x1xf32, #tpu.memory_space<vmem>>, %arg9: memref<8x128xf32, #tpu.memory_space<vmem>>) attributes {dimension_semantics = [#tpu.dimension_semantics<parallel>], iteration_bounds = array<i64: 1>, scalar_prefetch = 0 : i64, scratch_operands = 0 : i64, tpu.core_type = #tpu.core_type<tc>, window_params = [{transform_indices = @transform_0, window_bounds = array<i64: 8, 128>}, {pipeline_mode = #tpu.pipeline_mode<synchronous>, transform_indices = @transform_1, window_bounds = array<i64: 128, 128>}, {pipeline_mode = #tpu.pipeline_mode<synchronous>, transform_indices = @transform_2, window_bounds = array<i64: 1, 128>}, {pipeline_mode = #tpu.pipeline_mode<synchronous>, transform_indices = @transform_3, window_bounds = array<i64: 128, 128>}, {pipeline_mode = #tpu.pipeline_mode<synchronous>, transform_indices = @transform_4, window_bounds = array<i64: 1, 128>}, {pipeline_mode = #tpu.pipeline_mode<synchronous>, transform_indices = @transform_5, window_bounds = array<i64: 128, 128>}, {pipeline_mode = #tpu.pipeline_mode<synchronous>, transform_indices = @transform_6, window_bounds = array<i64: 1, 128>}, {transform_indices = @transform_7, window_bounds = array<i64: 8, 1>}, {transform_indices = @transform_8, window_bounds = array<i64: 8, 128>}]} {
    %c0 = arith.constant 0 : index
    %c0_0 = arith.constant 0 : index
    %0 = vector.load %arg1[%c0, %c0_0] : memref<8x128xbf16, #tpu.memory_space<vmem>>, vector<8x128xbf16>
    %c0_1 = arith.constant 0 : index
    %c0_2 = arith.constant 0 : index
    %1 = vector.load %arg2[%c0_1, %c0_2] : memref<128x128xbf16, #tpu.memory_space<vmem>>, vector<128x128xbf16>
    %cst = arith.constant dense<0.000000e+00> : vector<8x128xf32>
    %2 = tpu.matmul %0, %1, %cst {dimension_numbers = #tpu.dot_dimension_numbers<[1], [0], [0], [1], [0, 0, 1, 1], [], []>} : vector<8x128xbf16>, vector<128x128xbf16>, vector<8x128xf32> -> vector<8x128xf32>
    %c0_3 = arith.constant 0 : index
    %c0_4 = arith.constant 0 : index
    %3 = vector.load %arg3[%c0_3, %c0_4] : memref<1x128xf32, #tpu.memory_space<vmem>>, vector<1x128xf32>
    %4 = vector.broadcast %3 : vector<1x128xf32> to vector<8x128xf32>
    %5 = arith.addf %2, %4 : vector<8x128xf32>
    %cst_5 = arith.constant 0.000000e+00 : f32
    %6 = vector.broadcast %cst_5 : f32 to vector<8x128xf32>
    %7 = arith.maximumf %5, %6 : vector<8x128xf32>
    %8 = arith.truncf %7 : vector<8x128xf32> to vector<8x128xbf16>
    %c0_6 = arith.constant 0 : index
    %c0_7 = arith.constant 0 : index
    %9 = vector.load %arg4[%c0_6, %c0_7] : memref<128x128xbf16, #tpu.memory_space<vmem>>, vector<128x128xbf16>
    %cst_8 = arith.constant dense<0.000000e+00> : vector<8x128xf32>
    %10 = tpu.matmul %8, %9, %cst_8 {dimension_numbers = #tpu.dot_dimension_numbers<[1], [0], [0], [1], [0, 0, 1, 1], [], []>} : vector<8x128xbf16>, vector<128x128xbf16>, vector<8x128xf32> -> vector<8x128xf32>
    %c0_9 = arith.constant 0 : index
    %c0_10 = arith.constant 0 : index
    %11 = vector.load %arg5[%c0_9, %c0_10] : memref<1x128xf32, #tpu.memory_space<vmem>>, vector<1x128xf32>
    %12 = vector.broadcast %11 : vector<1x128xf32> to vector<8x128xf32>
    %13 = arith.addf %10, %12 : vector<8x128xf32>
    %cst_11 = arith.constant 0.000000e+00 : f32
    %14 = vector.broadcast %cst_11 : f32 to vector<8x128xf32>
    %15 = arith.maximumf %13, %14 : vector<8x128xf32>
    %16 = arith.truncf %15 : vector<8x128xf32> to vector<8x128xbf16>
    %c0_12 = arith.constant 0 : index
    %c0_13 = arith.constant 0 : index
    %17 = vector.load %arg6[%c0_12, %c0_13] : memref<128x128xbf16, #tpu.memory_space<vmem>>, vector<128x128xbf16>
    %cst_14 = arith.constant dense<0.000000e+00> : vector<8x128xf32>
    %18 = tpu.matmul %16, %17, %cst_14 {dimension_numbers = #tpu.dot_dimension_numbers<[1], [0], [0], [1], [0, 0, 1, 1], [], []>} : vector<8x128xbf16>, vector<128x128xbf16>, vector<8x128xf32> -> vector<8x128xf32>
    %c0_15 = arith.constant 0 : index
    %c0_16 = arith.constant 0 : index
    %19 = vector.load %arg7[%c0_15, %c0_16] : memref<1x128xf32, #tpu.memory_space<vmem>>, vector<1x128xf32>
    %20 = vector.broadcast %19 : vector<1x128xf32> to vector<8x128xf32>
    %21 = arith.addf %18, %20 : vector<8x128xf32>
    %c0_17 = arith.constant 0 : index
    %c0_18 = arith.constant 0 : index
    %22 = vector.load %arg8[%c0_17, %c0_18] : memref<8x1xf32, #tpu.memory_space<vmem>>, vector<8x1xf32>
    %23 = tpu.reciprocal %22 {approx = true} : vector<8x1xf32> -> vector<8x1xf32>
    %24 = vector.broadcast %23 : vector<8x1xf32> to vector<8x128xf32>
    %25 = arith.mulf %21, %24 : vector<8x128xf32>
    %c0_19 = arith.constant 0 : index
    %c0_20 = arith.constant 0 : index
    %26 = vector.load %arg9[%c0_19, %c0_20] : memref<8x128xf32, #tpu.memory_space<vmem>>, vector<8x128xf32>
    tpu.vector_store %arg9[%c0_19, %c0_20], %25 {strides = array<i32>} : memref<8x128xf32, #tpu.memory_space<vmem>>, vector<8x128xf32>,
    return
  }
  func.func @transform_0(%arg0: i32) -> (i32, i32) {
    %c0_i32 = arith.constant 0 : i32
    %c0_i32_0 = arith.constant 0 : i32
    return %arg0, %c0_i32 : i32, i32
  }
  func.func @transform_1(%arg0: i32) -> (i32, i32) {
    %c0_i32 = arith.constant 0 : i32
    %c0_i32_0 = arith.constant 0 : i32
    %c0_i32_1 = arith.constant 0 : i32
    return %c0_i32, %c0_i32_0 : i32, i32
  }
  func.func @transform_2(%arg0: i32) -> (i32, i32) {
    %c0_i32 = arith.constant 0 : i32
    %c0_i32_0 = arith.constant 0 : i32
    %c0_i32_1 = arith.constant 0 : i32
    return %c0_i32, %c0_i32_0 : i32, i32
  }
  func.func @transform_3(%arg0: i32) -> (i32, i32) {
    %c0_i32 = arith.constant 0 : i32
    %c0_i32_0 = arith.constant 0 : i32
    %c0_i32_1 = arith.constant 0 : i32
    return %c0_i32, %c0_i32_0 : i32, i32
  }
  func.func @transform_4(%arg0: i32) -> (i32, i32) {
    %c0_i32 = arith.constant 0 : i32
    %c0_i32_0 = arith.constant 0 : i32
    %c0_i32_1 = arith.constant 0 : i32
    return %c0_i32, %c0_i32_0 : i32, i32
  }
  func.func @transform_5(%arg0: i32) -> (i32, i32) {
    %c0_i32 = arith.constant 0 : i32
    %c0_i32_0 = arith.constant 0 : i32
    %c0_i32_1 = arith.constant 0 : i32
    return %c0_i32, %c0_i32_0 : i32, i32
  }
  func.func @transform_6(%arg0: i32) -> (i32, i32) {
    %c0_i32 = arith.constant 0 : i32
    %c0_i32_0 = arith.constant 0 : i32
    %c0_i32_1 = arith.constant 0 : i32
    return %c0_i32, %c0_i32_0 : i32, i32
  }
  func.func @transform_7(%arg0: i32) -> (i32, i32) {
    %c0_i32 = arith.constant 0 : i32
    %c0_i32_0 = arith.constant 0 : i32
    return %arg0, %c0_i32 : i32, i32
  }
  func.func @transform_8(%arg0: i32) -> (i32, i32) {
    %c0_i32 = arith.constant 0 : i32
    %c0_i32_0 = arith.constant 0 : i32
    return %arg0, %c0_i32 : i32, i32
  }
}

</mosaic_0001>

<bundles_post_ra>
// kernel: tpu_custom_call.1
= control target key start
LH: loop header
LB: loop body
LE: loop exit
PB: predicated region body
PF: predicated region fallthrough
CT: control target
= control target key end

     0   :  { %13 = vsyncpa [#allocation3], 0  ;;  %s842_s0 = inlined_call_operand.vmem [shape: bf16[8,128], index: 0, kind: input, shape index: {}]   ;;  %s843_s1 = inlined_call_operand.hbm [shape: bf16[128,128], index: 1, kind: input, shape index: {}]   ;;  %s844_s2 = inlined_call_operand.vmem [shape: f32[1,128], index: 2, kind: input, shape index: {}]   ;;  %s845_s3 = inlined_call_operand.hbm [shape: bf16[128,128], index: 3, kind: input, shape index: {}]   ;;  %s846_s4 = inlined_call_operand.vmem [shape: f32[1,128], index: 4, kind: input, shape index: {}]   ;;  %s847_s5 = inlined_call_operand.hbm [shape: bf16[128,128], index: 5, kind: input, shape index: {}]   ;;  %s848_s6 = inlined_call_operand.vmem [shape: f32[1,128], index: 6, kind: input, shape index: {}]   ;;  %s849_s7 = inlined_call_operand.vmem [shape: f32[8,1], index: 7, kind: input, shape index: {}]   ;;  %s850_s8 = inlined_call_operand.hbm [shape: f32[8,128], index: 8, kind: output, shape index: {}]  }
   0x1   :  { %14 = vsyncpa [#allocation6], 0 }
   0x2   :  { %15 = vsyncpa [#allocation4], 0  ;;  %s679_s27 = smov [#allocation5]   ;;  %s680_s29 = smov [#allocation2]  }
   0x3   :  { %s37_s28 = sshll.u32 %s679_s27, 4  ;;  %s23_s30 = sshll.u32 %s680_s29, 4  ;;  %s38_s28 = int_to_ptr.vmem [resolvable:$true] %s37_s28  ;;  %s733_s30 = int_to_ptr.vmem [resolvable:$true] %s23_s30 }
   0x4   :  { %s585_s11 = scalar_lea.hbm %s845_s3, 1024 }
   0x5   :  { %p586_p0 = scmp.ne.s32.totalorder %s845_s3, %s585_s11  ;;  %p589_p1 = scmp.lt.u32.totalorder %s585_s11, %s845_s3 }
   0x7   :  { %p591_p2 = pnand %p589_p1, %p586_p0 }
   0x9   :  { %594 = shalt.err (!%p591_p2)
}
   0xa   :  { %s595_s16 = scalar_lea.vmem %s38_s28, 1024  ;;  %p600_p4 = scmp.lt.s32.totalorder %s38_s28, %s38_s28 }
   0xb   :  { %p596_p3 = scmp.ne.s32.totalorder %s38_s28, %s595_s16  ;;  %p601_p5 = scmp.lt.s32.totalorder %s595_s16, %s595_s16 }
   0xd   :  { %p602_p6 = por %p601_p5, %p600_p4 }
   0xf   :  { %p603_p7 = pnand %p602_p6, %p596_p3 }
  0x11   :  { %606 = shalt.err (!%p603_p7)
}
  0x12   :  { %s681_s17 = smov 64   ;;  %s682_s18 = smov 4  }
  0x13   :  { %43 = dma.hbm_to_vmem [thread:$0]  %s845_s3, 1024, %s38_s28, [#allocation6], %s681_s17, %s681_s17, %s682_s18  }
  0x14   :  { %s607_s23 = scalar_lea.hbm %s843_s1, 1024 }
  0x15   :  { %p608_p8 = scmp.ne.s32.totalorder %s843_s1, %s607_s23  ;;  %p611_p9 = scmp.lt.u32.totalorder %s607_s23, %s843_s1 }
  0x17   :  { %p613_p10 = pnand %p611_p9, %p608_p8 }
  0x19   :  { %616 = shalt.err (!%p613_p10)
}
  0x1a   :  { %s617_s29 = scalar_lea.vmem %s733_s30, 1024  ;;  %p622_p12 = scmp.lt.s32.totalorder %s733_s30, %s733_s30 }
  0x1b   :  { %p618_p11 = scmp.ne.s32.totalorder %s733_s30, %s617_s29  ;;  %p623_p13 = scmp.lt.s32.totalorder %s617_s29, %s617_s29 }
  0x1d   :  { %p624_p0 = por %p623_p13, %p622_p12 }
  0x1f   :  { %p625_p1 = pnand %p624_p0, %p618_p11 }
  0x21   :  { %628 = shalt.err (!%p625_p1)
}
  0x22   :  { %29 = dma.hbm_to_vmem [thread:$0]  %s843_s1, 1024, %s733_s30, [#allocation3], %s681_s17, %s681_s17, %s682_s18  }
  0x23   :  { %s683_s9 = smov [#allocation7]   ;;  %s629_s13 = scalar_lea.hbm %s847_s5, 1024 }
  0x24   :  { %s51_s10 = sshll.u32 %s683_s9, 4  ;;  %p630_p2 = scmp.ne.s32.totalorder %s847_s5, %s629_s13  ;;  %s52_s10 = int_to_ptr.vmem [resolvable:$true] %s51_s10 }
  0x25   :  { %p633_p3 = scmp.lt.u32.totalorder %s629_s13, %s847_s5 }
  0x27   :  { %p635_p4 = pnand %p633_p3, %p630_p2 }
  0x29   :  { %638 = shalt.err (!%p635_p4)
}
  0x2a   :  { %s639_s20 = scalar_lea.vmem %s52_s10, 1024  ;;  %p644_p6 = scmp.lt.s32.totalorder %s52_s10, %s52_s10 }
  0x2b   :  { %p640_p5 = scmp.ne.s32.totalorder %s52_s10, %s639_s20  ;;  %p645_p7 = scmp.lt.s32.totalorder %s639_s20, %s639_s20 }
  0x2d   :  { %p646_p8 = por %p645_p7, %p644_p6 }
  0x2f   :  { %p647_p9 = pnand %p646_p8, %p640_p5 }
  0x31   :  { %650 = shalt.err (!%p647_p9)
}
  0x32   :  { %57 = dma.hbm_to_vmem [thread:$0]  %s847_s5, 1024, %s52_s10, [#allocation6], %s681_s17, %s681_s17, %s682_s18  }
  0x33   :  { %673 = dma.done.wait [#allocation3], 1024  }
  0x34   :  { %674 = vsyncadd [#allocation3], 4294966272 }
  0x35   :  { %675 = dma.done.wait [#allocation6], 2048  }
  0x36   :  { %676 = vsyncadd [#allocation6], 4294965248  ;;  %v684_v0 = vmov 0.0   ;;  %vm685_vm0 = vmmov 0   ;;  %v559_v1 = vld [vmem:[#allocation2] sm:$0xff]   ;;  %v560_v2 = vld [vmem:[#allocation2 + $0x8] sm:$0xff]  }
  0x37   :  { %489 = vmatprep.subr.bf16.mxu0 %v684_v0  ;;  %505 = vmatprep.mubr.msk.bf16.mxu0 %vm685_vm0, %v684_v0  ;;  %v561_v3 = vld [vmem:[#allocation2 + $0x10] sm:$0xff]   ;;  %v567_v4 = vld [vmem:[#allocation5] sm:$0xff]   ;;  %v562_v5 = vld [vmem:[#allocation2 + $0x18] sm:$0xff]   ;;  %v686_v35 = vmov 0  }
  0x38   :  { %509 = vmatprep.subr.bf16.mxu1 %v684_v0  ;;  %525 = vmatprep.mubr.msk.bf16.mxu1 %vm685_vm0, %v684_v0  ;;  %v568_v6 = vld [vmem:[#allocation5 + $0x8] sm:$0xff]   ;;  %v563_v7 = vld [vmem:[#allocation2 + $0x20] sm:$0xff]   ;;  %v569_v8 = vld [vmem:[#allocation5 + $0x10] sm:$0xff]  }
  0x39   :  { %490 = vmatpush3.bf16.msra.mxu0 %v559_v1  ;;  %510 = vmatpush3.bf16.msra.mxu1 %v567_v4  ;;  %v564_v9 = vld [vmem:[#allocation2 + $0x28] sm:$0xff]   ;;  %v570_v10 = vld [vmem:[#allocation5 + $0x18] sm:$0xff]   ;;  %v565_v11 = vld [vmem:[#allocation2 + $0x30] sm:$0xff]  }
  0x3a   :  { %491 = vmatprep.subr.bf16.mxu0 %v684_v0  ;;  %511 = vmatprep.subr.bf16.mxu1 %v684_v0  ;;  %v571_v12 = vld [vmem:[#allocation5 + $0x20] sm:$0xff]   ;;  %v566_v13 = vld [vmem:[#allocation2 + $0x38] sm:$0xff]   ;;  %v572_v14 = vld [vmem:[#allocation5 + $0x28] sm:$0xff]  }
  0x3b   :  { %v72_v15 = vld [vmem:[%s842_s0] sm:$0xf]  ;;  %v573_v16 = vld [vmem:[#allocation5 + $0x30] sm:$0xff]   ;;  %v574_v17 = vld [vmem:[#allocation5 + $0x38] sm:$0xff]   ;;  %558 = vset.pattern.permute.xlu0 %v686_v35 }
  0x3c   :  { %v575_v18 = vld [vmem:[#allocation7] sm:$0xff]   ;;  %v576_v19 = vld [vmem:[#allocation7 + $0x8] sm:$0xff]   ;;  %v577_v20 = vld [vmem:[#allocation7 + $0x10] sm:$0xff]  }
  0x3d   :  { %492 = vmatpush3.bf16.msra.mxu0 %v560_v2  ;;  %512 = vmatpush3.bf16.msra.mxu1 %v568_v6  ;;  %v578_v21 = vld [vmem:[#allocation7 + $0x18] sm:$0xff]   ;;  %v579_v22 = vld [vmem:[#allocation7 + $0x20] sm:$0xff]   ;;  %v580_v23 = vld [vmem:[#allocation7 + $0x28] sm:$0xff]  }
  0x3e   :  { %493 = vmatprep.subr.bf16.mxu0 %v684_v0  ;;  %513 = vmatprep.subr.bf16.mxu1 %v684_v0  ;;  %v435_v24 = vld [vmem:[%s844_s2] ss:$0 sm:$0xff]  ;;  %v581_v32 = vld [vmem:[#allocation7 + $0x30] sm:$0xff]   ;;  %v582_v33 = vld [vmem:[#allocation7 + $0x38] sm:$0xff]  }
  0x3f   :  { %v410_v34 = vld [vmem:[%s849_s7] sm:$0xff]  ;;  %s687_s7 = smov [#allocation8]  }
  0x40   :  { %583 = vrcp.f32 %v410_v34  ;;  %v444_v37 = vld [vmem:[%s846_s4] ss:$0 sm:$0xff]  ;;  %s425_s26 = sshll.u32 %s687_s7, 4  ;;  %s426_s26 = int_to_ptr.vmem [resolvable:$true] %s425_s26 }
  0x41   :  { %494 = vmatpush3.bf16.msra.mxu0 %v561_v3  ;;  %514 = vmatpush3.bf16.msra.mxu1 %v569_v8  ;;  %v453_v45 = vld [vmem:[%s848_s6] ss:$0 sm:$0xff]  ;;  %s651_s4 = scalar_lea.vmem %s426_s26, 128  ;;  %p656_p11 = scmp.lt.s32.totalorder %s426_s26, %s426_s26 }
  0x42   :  { %495 = vmatprep.subr.bf16.mxu0 %v684_v0  ;;  %515 = vmatprep.subr.bf16.mxu1 %v684_v0  ;;  %p652_p10 = scmp.ne.s32.totalorder %s426_s26, %s651_s4  ;;  %p657_p12 = scmp.lt.s32.totalorder %s651_s4, %s651_s4 }
  0x44   :  { %p658_p13 = por %p657_p12, %p656_p11 }
  0x45   :  { %496 = vmatpush3.bf16.msra.mxu0 %v562_v5  ;;  %516 = vmatpush3.bf16.msra.mxu1 %v570_v10 }
  0x46   :  { %497 = vmatprep.subr.bf16.mxu0 %v684_v0  ;;  %517 = vmatprep.subr.bf16.mxu1 %v684_v0  ;;  %p659_p0 = pnand %p658_p13, %p652_p10 }
  0x49   :  { %498 = vmatpush3.bf16.msra.mxu0 %v563_v7  ;;  %518 = vmatpush3.bf16.msra.mxu1 %v571_v12 }
  0x4a   :  { %499 = vmatprep.subr.bf16.mxu0 %v684_v0  ;;  %519 = vmatprep.subr.bf16.mxu1 %v684_v0  ;;  %v584_v36 = vpop.eup %583 }
  0x4b   :  { %414 = vperm.xlu0 %558, %v584_v36  }
  0x4d   :  { %500 = vmatpush3.bf16.msra.mxu0 %v564_v9  ;;  %520 = vmatpush3.bf16.msra.mxu1 %v572_v14 }
  0x4e   :  { %501 = vmatprep.subr.bf16.mxu0 %v684_v0  ;;  %521 = vmatprep.subr.bf16.mxu1 %v684_v0 }
  0x51   :  { %502 = vmatpush3.bf16.msra.mxu0 %v565_v11  ;;  %522 = vmatpush3.bf16.msra.mxu1 %v573_v16 }
  0x52   :  { %503 = vmatprep.subr.bf16.mxu0 %v684_v0  ;;  %523 = vmatprep.subr.bf16.mxu1 %v684_v0 }
  0x55   :  { %504 = vmatpush3.bf16.msra.mxu0 %v566_v13  ;;  %524 = vmatpush3.bf16.msra.mxu1 %v574_v17 }
  0x56   :  { %529 = vmatprep.subr.bf16.mxu0 %v684_v0 }
  0x58   :  { %506 = vmatmul.mubr.bf16.vlgmr.msra.gmra.mrb[0].mxu0 %v72_v15 }
  0x59   :  { %545 = vmatprep.mubr.msk.bf16.mxu0 %vm685_vm0, %v684_v0  ;;  %530 = vmatpush3.bf16.msra.mxu0 %v575_v18 }
  0x5a   :  { %531 = vmatprep.subr.bf16.mxu0 %v684_v0 }
  0x5d   :  { %532 = vmatpush3.bf16.msra.mxu0 %v576_v19 }
  0x5e   :  { %533 = vmatprep.subr.bf16.mxu0 %v684_v0 }
  0x61   :  { %534 = vmatpush3.bf16.msra.mxu0 %v577_v20 }
  0x62   :  { %535 = vmatprep.subr.bf16.mxu0 %v684_v0 }
  0x65   :  { %536 = vmatpush3.bf16.msra.mxu0 %v578_v21 }
  0x66   :  { %537 = vmatprep.subr.bf16.mxu0 %v684_v0 }
  0x69   :  { %538 = vmatpush3.bf16.msra.mxu0 %v579_v22 }
  0x6a   :  { %539 = vmatprep.subr.bf16.mxu0 %v684_v0 }
  0x6d   :  { %540 = vmatpush3.bf16.msra.mxu0 %v580_v23 }
  0x6e   :  { %541 = vmatprep.subr.bf16.mxu0 %v684_v0 }
  0x71   :  { %542 = vmatpush3.bf16.msra.mxu0 %v581_v32 }
  0x72   :  { %543 = vmatprep.subr.bf16.mxu0 %v684_v0 }
  0x75   :  { %544 = vmatpush3.bf16.msra.mxu0 %v582_v33 }
  0xca   :  { %v415_v47 = vpop.permute.xlu0 %414 }
 0x12b   :  { %v178_v25 = vpop.f32.mrb[0].mxu0 }
 0x12c   :  { %v179_v26 = vadd.f32 %v435_v24, %v178_v25  ;;  %v507_v27 = vpop.f32.mrb[1].mxu0 }
 0x12d   :  { %v181_v28 = vpop.f32.mrb[2].mxu0 }
 0x12e   :  { %v184_v29 = vmax.f32 %v179_v26, 0.0  ;;  %v508_v30 = vpop.f32.mrb[3].mxu0 }
 0x130   :  { %v185_v31 = vpack.c.bf16 %v184_v29, %v184_v29 }
 0x132   :  { %526 = vmatmul.mubr.bf16.vlgmr.msra.gmra.mrb[0].mxu1 %v185_v31 }
 0x205   :  { %v291_v38 = vpop.f32.mrb[0].mxu1 }
 0x206   :  { %v292_v39 = vadd.f32 %v444_v37, %v291_v38  ;;  %v527_v40 = vpop.f32.mrb[1].mxu1 }
 0x207   :  { %v294_v41 = vpop.f32.mrb[2].mxu1 }
 0x208   :  { %v297_v42 = vmax.f32 %v292_v39, 0.0  ;;  %v528_v43 = vpop.f32.mrb[3].mxu1 }
 0x20a   :  { %v298_v44 = vpack.c.bf16 %v297_v42, %v297_v42 }
 0x20c   :  { %546 = vmatmul.mubr.bf16.vlgmr.msra.gmra.mrb[4].mxu0 %v298_v44 }
 0x2df   :  { %v404_v46 = vpop.f32.mrb[4].mxu0 }
 0x2e0   :  { %v405_v48 = vadd.f32 %v453_v45, %v404_v46  ;;  %v547_v49 = vpop.f32.mrb[5].mxu0 }
 0x2e1   :  { %v407_v50 = vpop.f32.mrb[6].mxu0 }
 0x2e2   :  { %v417_v51 = vmul.f32 %v415_v47, %v405_v48  ;;  %v548_v52 = vpop.f32.mrb[7].mxu0 }
 0x2e4   :  { %418 = vst [vmem:[#allocation8] sm:$0xff] %v417_v51 }
 0x2e5   :  { %662 = shalt.err (!%p659_p0)
}
 0x2e6   :  { %s663_s29 = scalar_lea.hbm %s850_s8, 128 }
 0x2e7   :  { %p664_p1 = scmp.ne.s32.totalorder %s850_s8, %s663_s29  ;;  %p667_p2 = scmp.lt.u32.totalorder %s663_s29, %s850_s8 }
 0x2e9   :  { %p669_p3 = pnand %p667_p2, %p664_p1 }
 0x2eb   :  { %672 = shalt.err (!%p669_p3)
}
 0x2ec   :  { %428 = dma.vmem_to_hbm [thread:$0]  %s426_s26, 128, %s850_s8, [#allocation4]  }
 0x2ed   :  { %677 = dma.done.wait [#allocation4], 128  }
 0x2ee   :  { %678 = vsyncadd [#allocation4], 4294967168 }
 0x2ef   :  { %432 = vsyncpa [#allocation3], 1 }
 0x2f0   :  { %433 = vsyncpa [#allocation6], 1 }
 0x2f1   :  { %434 = vsyncpa [#allocation4], 1 }

</bundles_post_ra>
